<compile_context>
chip_gen: v6e
topology: v6e:2x2x1
jax: 0.10.0
libtpu: 0.0.40
codegen_flags: <defaults>
</compile_context>

<pallas_src>
import jax
import jax.numpy as jnp
from jax import lax
from jax.experimental import pallas as pl
from jax.experimental.pallas import tpu as pltpu


def _round_up(x, m):
    return ((x + m - 1) // m) * m


def _pick_tile(extent, base, candidates):
    """Largest candidate tile that exactly divides the base-padded extent (no waste)."""
    r = _round_up(extent, base)
    for c in candidates:
        if c <= r and r % c == 0:
            return c
    return base


# ---------------------------------------------------------------------------
# K1: pairwise squared euclidean distance (findConfounders, method='euc')
# ---------------------------------------------------------------------------
def _sqdist_kernel(sw_ref, w_ref, w2_ref, o_ref):
    sw = sw_ref[...]                                              # (TB, D)
    w = w_ref[...]                                                # (TC, D)
    # NT matmul (contract last dims) -> MXU, no materialized transpose.
    ww = lax.dot_general(sw, w,
                         dimension_numbers=(((1,), (1,)), ((), ())),
                         preferred_element_type=jnp.float32)      # (TB, TC)
    sw2 = jnp.sum(sw * sw, axis=-1, keepdims=True)                # (TB, 1)  lane reduce
    o_ref[...] = sw2 - 2.0 * ww + w2_ref[...]                     # + (1, TC)


def pairwise_sqdist(sample_w, weight):
    B, D = sample_w.shape
    C, D2 = weight.shape
    assert D == D2
    tb = _pick_tile(B, 8, (256, 128, 64, 32, 16, 8))
    tc = _pick_tile(C, 128, (512, 256, 128))
    Bp, Cp = _round_up(B, tb), _round_up(C, tc)

    sw_p = sample_w if Bp == B else jnp.pad(sample_w, ((0, Bp - B), (0, 0)))
    w_p = weight if Cp == C else jnp.pad(weight, ((0, Cp - C), (0, 0)))
    # ||w_c||^2 once per class, passed as a (1, Cp) row vector (avoids per-batch-tile
    # recompute and a sublane->lane relayout inside the kernel).
    w2 = jnp.sum(w_p * w_p, axis=1, dtype=jnp.float32).reshape(1, Cp)

    out = pl.pallas_call(
        _sqdist_kernel,
        out_shape=jax.ShapeDtypeStruct((Bp, Cp), jnp.float32),
        grid_spec=pltpu.PrefetchScalarGridSpec(
            num_scalar_prefetch=0,
            grid=(Bp // tb, Cp // tc),
            in_specs=[
                pl.BlockSpec((tb, D), lambda i, j: (i, 0)),
                pl.BlockSpec((tc, D), lambda i, j: (j, 0)),
                pl.BlockSpec((1, tc), lambda i, j: (0, j)),
            ],
            out_specs=pl.BlockSpec((tb, tc), lambda i, j: (i, j)),
        ),
        compiler_params=pltpu.CompilerParams(
            dimension_semantics=("parallel", "parallel")),
    )(sw_p, w_p, w2)
    return out[:B, :C]


# ---------------------------------------------------------------------------
# K2: total_density_detached = clamp(sum_k exp(-(w_topk - mu)^2 / (2 var)), 1e-8)
# ---------------------------------------------------------------------------
def _tdd_kernel(tw_ref, mu_ref, var_ref, o_ref, acc_ref):
    k = pl.program_id(1)

    @pl.when(k == 0)
    def _():
        acc_ref[...] = jnp.zeros_like(acc_ref)

    neg_inv_2var = -0.5 / var_ref[...]                            # (TB, D)
    diff = tw_ref[...] - mu_ref[...][:, None, :]                  # (TB, TK, D)
    dens = jnp.exp(diff * diff * neg_inv_2var[:, None, :])        # EUP exp, mul not div
    acc_ref[...] += jnp.sum(dens, axis=1)                         # sublane reduce

    @pl.when(k == pl.num_programs(1) - 1)
    def _():
        o_ref[...] = jnp.maximum(acc_ref[...], 1e-8)


def confounder_density_sum(topk_w, mu, var):
    B, K, D = topk_w.shape
    tb = _pick_tile(B, 8, (64, 32, 16, 8))
    tk = _pick_tile(K, 128, (256, 128))
    Bp, Kpad = _round_up(B, tb), _round_up(K, tk)
    if Bp != B or Kpad != K:
        # Pad with a huge value so padded rows contribute exp(-huge) == 0 to the sum.
        topk_w = jnp.pad(topk_w, ((0, Bp - B), (0, Kpad - K), (0, 0)),
                         constant_values=1e18)
    mu_p = mu if Bp == B else jnp.pad(mu, ((0, Bp - B), (0, 0)))
    var_p = var if Bp == B else jnp.pad(var, ((0, Bp - B), (0, 0)), constant_values=1.0)

    out = pl.pallas_call(
        _tdd_kernel,
        out_shape=jax.ShapeDtypeStruct((Bp, D), jnp.float32),
        grid_spec=pltpu.PrefetchScalarGridSpec(
            num_scalar_prefetch=0,
            grid=(Bp // tb, Kpad // tk),          # K reduction axis innermost
            in_specs=[
                pl.BlockSpec((tb, tk, D), lambda i, k: (i, k, 0)),
                pl.BlockSpec((tb, D), lambda i, k: (i, 0)),   # resident across k
                pl.BlockSpec((tb, D), lambda i, k: (i, 0)),   # resident across k
            ],
            out_specs=pl.BlockSpec((tb, D), lambda i, k: (i, 0)),
            scratch_shapes=[pltpu.VMEM((tb, D), jnp.float32)],
        ),
        compiler_params=pltpu.CompilerParams(
            dimension_semantics=("parallel", "arbitrary")),
    )(topk_w, mu_p, var_p)
    return out[:B]


# ---------------------------------------------------------------------------
# K3: fused density / overly / confid (mean over D) per batch tile
# ---------------------------------------------------------------------------
def _confid_kernel(sw_ref, mu_ref, var_ref, acd_ref, ntv_ref, tdd_ref, o_ref):
    sw = sw_ref[...]
    mu = mu_ref[...]
    var = var_ref[...]
    diff = sw - mu
    density = jnp.exp(-(diff * diff) / (2.0 * var))               # (TB, D)

    acd = acd_ref[...]                                            # (TB, Kc, D)
    ntv = ntv_ref[...] != 0                                       # bool (TB, Kc, D)
    total_density = jnp.maximum(jnp.sum(acd, axis=1), 1e-8)       # (TB, D)

    Kc = acd.shape[1]
    # class index grid along the Kc axis (2D iota on the sublane axis, broadcast over TB)
    kidx = lax.broadcasted_iota(jnp.int32, (Kc, acd.shape[2]), 0)  # (Kc, D)
    amin = jnp.min(acd, axis=1, keepdims=True)                     # (TB, 1, D)
    # first occurrence of the per-(b,d) minimum == torch argmin; scatter it to False
    first_min = jnp.min(jnp.where(acd == amin, kidx, Kc),
                        axis=1, keepdims=True)                     # (TB, 1, D)
    ntv = ntv & (kidx != first_min)                                # (TB, Kc, D)

    minv = jnp.min(acd + jnp.where(ntv, 0.0, 1000.0), axis=1, keepdims=True)
    maxv = jnp.max(acd - jnp.where(ntv, 1000.0, 0.0), axis=1, keepdims=True)
    overly = ntv & ((minv - maxv) >= 0.2 * total_density[:, None, :])
    overly_f = overly.astype(jnp.float32)

    ratio_main = density / total_density                           # (TB, D)
    ratio_pen = density / tdd_ref[...]                             # (TB, D)
    confid = (ratio_main[:, None, :] * (1.0 - overly_f)
              - ratio_pen[:, None, :] * overly_f)                  # (TB, Kc, D)
    o_ref[...] = jnp.mean(confid, axis=-1)                         # (TB, Kc)


def confid_blocks(sample_w, mu, var, all_class_density, nontrivial_i32, tdd):
    B, Kc, D = all_class_density.shape
    tb = _pick_tile(B, 8, (128, 64, 32, 16, 8))
    Bp = _round_up(B, tb)

    def padb(a, cval=0.0):
        if Bp == B:
            return a
        pad = [(0, Bp - B)] + [(0, 0)] * (a.ndim - 1)
        return jnp.pad(a, pad, constant_values=cval)

    sw_p, mu_p = padb(sample_w), padb(mu)
    var_p, tdd_p = padb(var, 1.0), padb(tdd, 1.0)        # keep padded rows finite
    acd_p, ntv_p = padb(all_class_density), padb(nontrivial_i32)

    out = pl.pallas_call(
        _confid_kernel,
        out_shape=jax.ShapeDtypeStruct((Bp, Kc), jnp.float32),
        grid_spec=pltpu.PrefetchScalarGridSpec(
            num_scalar_prefetch=0,
            grid=(Bp // tb,),
            in_specs=[
                pl.BlockSpec((tb, D), lambda i: (i, 0)),
                pl.BlockSpec((tb, D), lambda i: (i, 0)),
                pl.BlockSpec((tb, D), lambda i: (i, 0)),
                pl.BlockSpec((tb, Kc, D), lambda i: (i, 0, 0)),
                pl.BlockSpec((tb, Kc, D), lambda i: (i, 0, 0)),
                pl.BlockSpec((tb, D), lambda i: (i, 0)),
            ],
            out_specs=pl.BlockSpec((tb, Kc), lambda i: (i, 0)),
        ),
        compiler_params=pltpu.CompilerParams(dimension_semantics=("parallel",)),
    )(sw_p, mu_p, var_p, acd_p, ntv_p, tdd_p)
    return out[:B]


# ---------------------------------------------------------------------------
# Full forward
# ---------------------------------------------------------------------------
def density_softmax_forward(weight, mu, var, labels, all_class_density, nontrivial,
                            topk_k=512):
    weight = weight.astype(jnp.float32)
    mu = mu.astype(jnp.float32)
    var = var.astype(jnp.float32)
    acd = all_class_density.astype(jnp.float32)
    ntv_i32 = nontrivial.astype(jnp.int32)

    sample_w = jnp.take(weight, labels, axis=0)               # weight[labels], tiny gather

    # findConfounders (method='euc'): distance matrix on the MXU, then top-k (host).
    dis = pairwise_sqdist(sample_w, weight)                   # (B, C)
    _, topk_idx = lax.top_k(-dis, topk_k)                     # K smallest distances
    topk_w = jnp.take(weight, topk_idx, axis=0)               # (B, K, D) gather

    tdd = confounder_density_sum(topk_w, mu, var)             # (B, D)
    confid_bk = confid_blocks(sample_w, mu, var, acd, ntv_i32, tdd)   # (B, K')
    return jnp.mean(confid_bk)                                # confid.mean(-1).mean()


# ---------------------------------------------------------------------------
# Pure-JAX reference mirroring the PyTorch module
# ---------------------------------------------------------------------------
def _reference(weight, mu, var, labels, all_class_density, nontrivial, topk_k=512):
    sample_weight = weight[labels]
    density = jnp.exp(-(sample_weight - mu) ** 2 / (2.0 * var))
    total_density = jnp.maximum(all_class_density.sum(axis=1), 1e-8)
    # method == 1 branch
    indices = jnp.argmin(all_class_density, axis=1)                     # (B, D)
    Kc = all_class_density.shape[1]
    kidx = jnp.arange(Kc)[None, :, None]
    ntv = nontrivial & (kidx != indices[:, None, :])                    # scatter -> False
    minv = jnp.min(all_class_density + (~ntv) * 1000.0, axis=1, keepdims=True)
    maxv = jnp.max(all_class_density - ntv * 1000.0, axis=1, keepdims=True)
    overly = (ntv & (minv - maxv >= 0.2 * total_density[:, None, :])).astype(jnp.float32)
    confid = density[:, None, :] / total_density[:, None, :] * (1.0 - overly)
    # penalize branch
    sw2 = (sample_weight ** 2).sum(axis=1, keepdims=True)
    w2 = (weight ** 2).sum(axis=1)[None, :]
    dis = sw2 - 2.0 * (sample_weight @ weight.T) + w2
    _, topk_idx = lax.top_k(-dis, topk_k)
    topk_weight = weight[topk_idx]
    acdd = jnp.exp(-(topk_weight - mu[:, None, :]) ** 2 / (2.0 * var[:, None, :]))
    tdd = jnp.maximum(acdd.sum(axis=1), 1e-8)
    confid = confid - density[:, None, :] / tdd[:, None, :] * overly
    return confid.mean(axis=-1).mean()


if __name__ == "__main__":
    def run_case(case_key, B, D, C, Kc, K):
        k1, k2, k3, k4, k5, k6 = jax.random.split(case_key, 6)
        weight = jax.random.normal(k1, (C, D), dtype=jnp.float32)
        mu = jax.random.normal(k2, (B, D), dtype=jnp.float32)
        var = jax.random.uniform(k3, (B, D), minval=0.5, maxval=1.5, dtype=jnp.float32)
        labels = jax.random.randint(k4, (B,), 0, C, dtype=jnp.int32)
        all_class_density = jax.random.uniform(k5, (B, Kc, D), dtype=jnp.float32)
        nontrivial = jax.random.uniform(k6, (B, Kc, D)) > 0.3

        out = density_softmax_forward(weight, mu, var, labels, all_class_density,
                                      nontrivial, topk_k=K)
        out = jax.block_until_ready(out)
        ref = _reference(weight, mu, var, labels, all_class_density, nontrivial,
                         topk_k=K)
        assert out.shape == ()
        assert not bool(jnp.isnan(out)), "confid has NaN"
        assert jnp.allclose(out, ref, atol=1e-4, rtol=1e-3), \
            f"mismatch: pallas={float(out)} ref={float(ref)}"

    key = jax.random.PRNGKey(0)
    ka, kb = jax.random.split(key)
    # Case 1: module's native K=512 confounders, aligned shapes.
    run_case(ka, B=8, D=128, C=640, Kc=8, K=512)
    # Case 2: non-multiple batch / class / K counts -> exercises padding, multi-tile
    #         class grid and multi-step K accumulation.
    run_case(kb, B=12, D=128, C=600, Kc=8, K=300)

    print("KERNEL_OK")
</pallas_src>

<mosaic_0001>
module attributes {stable_mosaic.version = 11 : i64} {
  func.func @_sqdist_kernel(%arg0: i32, %arg1: i32, %arg2: memref<8x128xf32, #tpu.memory_space<vmem>>, %arg3: memref<128x128xf32, #tpu.memory_space<vmem>>, %arg4: memref<1x128xf32, #tpu.memory_space<vmem>>, %arg5: memref<8x128xf32, #tpu.memory_space<vmem>>) attributes {dimension_semantics = [#tpu.dimension_semantics<parallel>, #tpu.dimension_semantics<parallel>], iteration_bounds = array<i64: 1, 5>, scalar_prefetch = 0 : i64, scratch_operands = 0 : i64, tpu.core_type = #tpu.core_type<tc>, window_params = [{transform_indices = @transform_0, window_bounds = array<i64: 8, 128>}, {transform_indices = @transform_1, window_bounds = array<i64: 128, 128>}, {transform_indices = @transform_2, window_bounds = array<i64: 1, 128>}, {transform_indices = @transform_3, window_bounds = array<i64: 8, 128>}]} {
    %c0 = arith.constant 0 : index
    %c0_0 = arith.constant 0 : index
    %0 = vector.load %arg2[%c0, %c0_0] : memref<8x128xf32, #tpu.memory_space<vmem>>, vector<8x128xf32>
    %c0_1 = arith.constant 0 : index
    %c0_2 = arith.constant 0 : index
    %1 = vector.load %arg3[%c0_1, %c0_2] : memref<128x128xf32, #tpu.memory_space<vmem>>, vector<128x128xf32>
    %cst = arith.constant dense<0.000000e+00> : vector<8x128xf32>
    %2 = tpu.matmul %0, %1, %cst {dimension_numbers = #tpu.dot_dimension_numbers<[1], [1], [0], [0], [0, 0, 1, 0], [], []>} : vector<8x128xf32>, vector<128x128xf32>, vector<8x128xf32> -> vector<8x128xf32>
    %3 = arith.mulf %0, %0 : vector<8x128xf32>
    %cst_3 = arith.constant dense<0.000000e+00> : vector<8xf32>
    %4 = vector.multi_reduction <add>, %3, %cst_3 [1] : vector<8x128xf32> to vector<8xf32>
    %5 = vector.shape_cast %4 : vector<8xf32> to vector<8x1xf32>
    %cst_4 = arith.constant 2.000000e+00 : f32
    %6 = vector.broadcast %cst_4 : f32 to vector<8x128xf32>
    %7 = arith.mulf %6, %2 : vector<8x128xf32>
    %8 = vector.broadcast %5 : vector<8x1xf32> to vector<8x128xf32>
    %9 = arith.subf %8, %7 : vector<8x128xf32>
    %c0_5 = arith.constant 0 : index
    %c0_6 = arith.constant 0 : index
    %10 = vector.load %arg4[%c0_5, %c0_6] : memref<1x128xf32, #tpu.memory_space<vmem>>, vector<1x128xf32>
    %11 = vector.broadcast %10 : vector<1x128xf32> to vector<8x128xf32>
    %12 = arith.addf %9, %11 : vector<8x128xf32>
    %c0_7 = arith.constant 0 : index
    %c0_8 = arith.constant 0 : index
    %13 = vector.load %arg5[%c0_7, %c0_8] : memref<8x128xf32, #tpu.memory_space<vmem>>, vector<8x128xf32>
    tpu.vector_store %arg5[%c0_7, %c0_8], %12 {strides = array<i32>} : memref<8x128xf32, #tpu.memory_space<vmem>>, vector<8x128xf32>,
    return
  }
  func.func @transform_0(%arg0: i32, %arg1: i32) -> (i32, i32) {
    %c0_i32 = arith.constant 0 : i32
    %c0_i32_0 = arith.constant 0 : i32
    return %arg0, %c0_i32 : i32, i32
  }
  func.func @transform_1(%arg0: i32, %arg1: i32) -> (i32, i32) {
    %c0_i32 = arith.constant 0 : i32
    %c0_i32_0 = arith.constant 0 : i32
    return %arg1, %c0_i32 : i32, i32
  }
  func.func @transform_2(%arg0: i32, %arg1: i32) -> (i32, i32) {
    %c0_i32 = arith.constant 0 : i32
    %c0_i32_0 = arith.constant 0 : i32
    return %c0_i32, %arg1 : i32, i32
  }
  func.func @transform_3(%arg0: i32, %arg1: i32) -> (i32, i32) {
    %c0_i32 = arith.constant 0 : i32
    return %arg0, %arg1 : i32, i32
  }
}

</mosaic_0001>

<bundles_post_ra>
// kernel: tpu_custom_call.1
= control target key start
LH: loop header
LB: loop body
LE: loop exit
PB: predicated region body
PF: predicated region fallthrough
CT: control target
= control target key end

     0   :  { %8 = vsyncpa [#allocation3], 0  ;;  %s1039_s0 = inlined_call_operand.hbm [shape: f32[8,128], index: 0, kind: input, shape index: {}]   ;;  %s1040_s1 = inlined_call_operand.hbm [shape: f32[640,128], index: 1, kind: input, shape index: {}]   ;;  %s1041_s2 = inlined_call_operand.hbm [shape: f32[1,640], index: 2, kind: input, shape index: {}]   ;;  %s1042_s3 = inlined_call_operand.hbm [shape: f32[8,640], index: 3, kind: output, shape index: {}]  }
   0x1   :  { %9 = vsyncpa [#allocation6], 0 }
   0x2   :  { %11 = vsyncpa [#allocation6 + $0x1], 0 }
   0x3   :  { %12 = vsyncpa [#allocation4], 0 }
   0x4   :  { %14 = vsyncpa [#allocation4 + $0x1], 0  ;;  %s832_s12 = smov 0   ;;  %s834_s13 = smov 0  }
   0x5   :  { %s836_s14 = smov 0   ;;  %s838_s15 = smov 0  }
   0x6   :  { %s840_s16 = smov 0   ;;  %s842_s17 = smov 0  }
   0x7 LB: > { %s29_s18 = sadd.s32 1, %s798_s16  ;;  %s65_s19 = sadd.s32 1, %s790_s14  ;;  %s802_s17 = sphi %s842_s17, %s20_s17   ;;  %s798_s16 = sphi %s840_s16, %s1061_s16   ;;  %s794_s15 = sphi %s838_s15, %s1060_s15   ;;  %s790_s14 = sphi %s836_s14, %s1059_s14   ;;  %s786_s13 = sphi %s834_s13, %s1058_s13   ;;  %s782_s12 = sphi %s832_s12, %s1057_s12  }
   0x8   : > { %p30_p0 = scmp.ge.s32.totalorder %s29_s18, 5  ;;  %p72_p1 = scmp.ne.s32.totalorder %s790_s14, %s786_s13 }
   0x9   : > { %p73_p2 = scmp.eq.s32.totalorder %s802_s17, 0  ;;  %p580_p4 = scmp.lt.s32.totalorder %s802_s17, 5 }
   0xa   : > { %s1063_s18 = smov (%p30_p0, %s29_s18), 0  ;;  %s169_s21 = sand.u32 1, %s802_s17  }
   0xb   : > { %p74_p3 = por %p73_p2, %p72_p1  ;;  %s62_s20 = ssub.s32 %s798_s16, %s1063_s18 }
   0xc   : > { %p63_p5 = scmp.eq.s32.totalorder %s62_s20, 0  ;;  %s171_s22 = sand.u32 1, %s790_s14  }
   0xd   : > { %s501_s23 = sshll.u32 %s798_s16, 11  ;;  %s488_s25 = sshll.u32 %s171_s22, 7 }
   0xe   : > { %s879_s24 = scalar_select %p63_p5, %s790_s14, %s65_s19  }
   0xf   : > { %s179_s28 = scalar_lea.hbm %s1040_s1, %s501_s23  ;;  %p886_p6 = pnand %p580_p4, %p74_p3 }
  0x10   : > { %s173_s30 = scalar_lea.vmem [#allocation5], %s488_s25  ;;  %s890_s5 = scalar_lea.sflag [#allocation6], %s169_s21 }
  0x11   : > { %s180_s4 = sshll.u32 %s173_s30, 4  ;;  %p638_p7 = pneg %p886_p6  ;;  %s181_s4 = int_to_ptr.vmem [resolvable:$true] %s180_s4 }
  0x12   : > { %s649_s6 = scalar_lea.vmem %s181_s4, 2048  ;;  %s804_s7 = smov [#allocation5]  }
  0x13   : > { %p650_p8 = scmp.ne.s32.totalorder %s181_s4, %s649_s6  ;;  %s654_s8 = sshll.u32 %s804_s7, 4  ;;  %s655_s8 = int_to_ptr.vmem [resolvable:$false] %s654_s8 }
  0x14   : > { %s656_s9 = scalar_lea.vmem %s655_s8, 4096  ;;  %p657_p11 = scmp.lt.s32.totalorder %s181_s4, %s655_s8 }
  0x15   : > { %p652_p9 = pnand %p650_p8, %p638_p7  ;;  %p658_p12 = scmp.lt.s32.totalorder %s656_s9, %s649_s6 }
  0x17   : > { %p653_p10 = pneg %p652_p9  ;;  %p659_p13 = por %p658_p12, %p657_p11 }
  0x19   : > { %p660_p0 = pnand %p659_p13, %p653_p10 }
  0x1b   : > { %663 = shalt.err (!%p660_p0)
}
  0x1c   : > { %s805_s10 = smov 128   ;;  %s806_s11 = smov 8  }
  0x1d   : > { %571 = dma.hbm_to_vmem [thread:$0]  (!%p886_p6), %s179_s28, 2048, %s181_s4, %s890_s5, %s805_s10, %s805_s10, %s806_s11  }
  0x1e   : > { %s901_s19 = sadd.s32 4294967295, %s802_s17   ;;  %s484_s20 = sadd.s32 4294967294, %s802_s17  }
  0x1f   : > { %p78_p2 = scmp.ne.s32.totalorder %s786_s13, %s782_s12  ;;  %p1044_p3 = scmp.eq.s32.totalorder %s901_s19, 0 }
  0x20   : > { %p130_p4 = scmp.eq.s32.totalorder %s901_s19, 4  ;;  %p136_p5 = scmp.eq.s32.totalorder %s484_s20, 4 }
  0x21   : > { %p485_p8 = scmp.ge.s32.totalorder %s802_s17, 1  ;;  %p911_p9 = por %p1044_p3, %p78_p2 }
  0x22   : > { %p918_p10 = por %p130_p4, %p72_p1  ;;  %p922_p11 = por %p136_p5, %p78_p2 }
  0x23   : > { %s1047_s21 = scalar_select %p911_p9, 1, 0 }
  0x24   : > { %s1048_s23 = scalar_select %p918_p10, 1, 0 }
  0x25   : > { %s1049_s25 = scalar_select %p922_p11, 1, 0 }
  0x26   : > { %p143_p12 = scmp.lt.s32.totalorder %s802_s17, 6  ;;  %s807_s27 = smov [#allocation2]  }
  0x27   : > { %s158_s28 = sshll.u32 %s807_s27, 4  ;;  %s491_s30 = sshll.u32 %s798_s16, 4  ;;  %s931_s28 = int_to_ptr.vmem [resolvable:$true] %s158_s28 }
  0x28   : > { %p927_p13 = pnand %p485_p8, %p143_p12  ;;  %s198_s7 = scalar_lea.hbm %s1041_s2, %s491_s30 }
  0x29   : > { %s193_s8 = scalar_lea.vmem [#allocation7], %s171_s22  ;;  %s808_s20 = smov [#allocation7]  }
  0x2a   : > { %p564_p1 = pneg %p927_p13  ;;  %s200_s9 = sshll.u32 %s193_s8, 4  ;;  %s201_s9 = int_to_ptr.vmem [resolvable:$true] %s200_s9 }
  0x2b   : > { %s677_s11 = scalar_lea.vmem %s201_s9, 16  ;;  %s682_s27 = sshll.u32 %s808_s20, 4  ;;  %s683_s27 = int_to_ptr.vmem [resolvable:$false] %s682_s27 }
  0x2c   : > { %p943_p0 = pnand %p564_p1, %p1044_p3  ;;  %p678_p2 = scmp.ne.s32.totalorder %s201_s9, %s677_s11 }
  0x2d   : > { %s684_s4 = scalar_lea.vmem %s683_s27, 32  ;;  %p685_p8 = scmp.lt.s32.totalorder %s201_s9, %s683_s27 }
  0x2e   : > { %p680_p4 = pnand %p678_p2, %p638_p7  ;;  %p686_p12 = scmp.lt.s32.totalorder %s684_s4, %s677_s11 }
  0x30   : > { %p681_p5 = pneg %p680_p4  ;;  %p687_p11 = por %p686_p12, %p685_p8 }
  0x32   : > { %p688_p10 = pnand %p687_p11, %p681_p5 }
  0x34   : > { %691 = shalt.err (!%p688_p10)
}
  0x35   : > { %574 = dma.hbm_to_vmem [thread:$0]  (!%p886_p6), %s198_s7, 16, %s201_s9, %s890_s5  }
  0x36   : > { %p694_p7 = pneg %p943_p0  ;;  %s703_s22 = scalar_lea.vmem %s931_s28, 128 }
  0x37   : > { %p704_p1 = scmp.ne.s32.totalorder %s931_s28, %s703_s22  ;;  %p711_p3 = scmp.lt.s32.totalorder %s931_s28, %s931_s28 }
  0x38   : > { %p712_p9 = scmp.lt.s32.totalorder %s703_s22, %s703_s22 }
  0x39   : > { %p706_p2 = pnand %p704_p1, %p694_p7 }
  0x3a   : > { %p713_p8 = por %p712_p9, %p711_p3 }
  0x3b   : > { %p707_p4 = pneg %p706_p2 }
  0x3d   : > { %p714_p11 = pnand %p713_p8, %p707_p4 }
  0x3f   : > { %717 = shalt.err (!%p714_p11)
}
  0x40   : > { %567 = dma.hbm_to_vmem [thread:$0]  (!%p943_p0), %s1039_s0, 128, %s931_s28, [#allocation3]  }
  0x41   : > { %209 = sbr.rel (%p927_p13) target bundleno = 353 (0x161), region = 32  ;;  %p1052_p6 = scmp.eq.s32.totalorder (!%p927_p13), %s901_s19, 0 }
  0x46   : > { %769 = dma.done.wait (%p1052_p6), [#allocation3], 128   ;;  %p1053_p10 = pmov %p1052_p6 }
  0x47   : > { %s215_s5 = sand.u32 1, %s901_s19   ;;  %s973_s6 = sand.u32 1, %s786_s13  }
  0x48   : > { %771 = vsyncadd (%p1053_p10), [#allocation3], 4294967168  ;;  %s494_s7 = sshll.u32 %s973_s6, 7  ;;  %s216_s8 = scalar_lea.sflag [#allocation6], %s215_s5 }
  0x49   : > { %s976_s9 = scalar_lea.vmem [#allocation5], %s494_s7  ;;  %p1054_p3 = scmp.ne.s32.totalorder %s1047_s21, 0 }
  0x4b   : > { %773 = dma.done.wait (%p1054_p3), %s216_s8, 2064  }
  0x4c   : > { %775 = vsyncadd (%p1054_p3), %s216_s8, 4294965232  ;;  %v809_v0 = vmov 0.0   ;;  %vm810_vm0 = vmmov 0   ;;  %v271_v1 = vld [vmem:[%s976_s9 + $0x78] sm:$0xff]  ;;  %v270_v2 = vld [vmem:[%s976_s9 + $0x70] sm:$0xff]  ;;  %s495_s19 = sshll.u32 %s973_s6, 3 }
  0x4d   : > { %519 = vmatprep.subr.mxu0 %v809_v0  ;;  %551 = vmatprep.mubr.msk.f32.mxu0 %vm810_vm0, %v809_v0  ;;  %v255_v3 = vld [vmem:[#allocation2] sm:$0xff]  ;;  %v269_v4 = vld [vmem:[%s976_s9 + $0x68] sm:$0xff]  ;;  %v268_v6 = vld [vmem:[%s976_s9 + $0x60] sm:$0xff]  ;;  %s227_s21 = scalar_lea.vmem [#allocation7], %s973_s6  ;;  %s498_s26 = sshll.u32 %s794_s15, 7 }
  0x4e   : > { %520 = vmatpush3.xpose.msra.mxu0 %v271_v1  ;;  %v342_v5 = vmul.f32 %v255_v3, %v255_v3  ;;  %v267_v7 = vld [vmem:[%s976_s9 + $0x58] sm:$0xff]  ;;  %v266_v8 = vld [vmem:[%s976_s9 + $0x50] sm:$0xff]  ;;  %v265_v9 = vld [vmem:[%s976_s9 + $0x48] sm:$0xff]  ;;  %s253_s28 = scalar_lea.vmem [#allocation8], %s495_s19  ;;  %s370_s27 = scalar_lea.hbm %s1042_s3, %s498_s26 }
  0x4f   : > { %521 = vmatprep.subr.mxu0 %v809_v0  ;;  %v264_v10 = vld [vmem:[%s976_s9 + $0x40] sm:$0xff]  ;;  %v263_v11 = vld [vmem:[%s976_s9 + $0x38] sm:$0xff]  ;;  %v262_v12 = vld [vmem:[%s976_s9 + $0x30] sm:$0xff]  ;;  %s372_s10 = sshll.u32 %s253_s28, 4  ;;  %s357_s4 = scalar_lea.sflag [#allocation4], %s973_s6  ;;  %s373_s10 = int_to_ptr.vmem [resolvable:$true] %s372_s10 }
  0x50   : > { %343 = vadd.xlane.f32.xlu0 %v342_v5  ;;  %v261_v13 = vld [vmem:[%s976_s9 + $0x28] sm:$0xff]  ;;  %v260_v14 = vld [vmem:[%s976_s9 + $0x20] sm:$0xff]  ;;  %v259_v15 = vld [vmem:[%s976_s9 + $0x18] sm:$0xff]  ;;  %s718_s22 = scalar_lea.vmem %s373_s10, 128  ;;  %p1055_p13 = scmp.ne.s32.totalorder %s1048_s23, 0 }
  0x51   : > { %v258_v16 = vld [vmem:[%s976_s9 + $0x10] sm:$0xff]  ;;  %v257_v17 = vld [vmem:[%s976_s9 + $0x8] sm:$0xff]  ;;  %v256_v18 = vld [vmem:[%s976_s9] sm:$0xff]  ;;  %p719_p9 = scmp.ne.s32.totalorder %s373_s10, %s718_s22  ;;  %s811_s29 = smov [#allocation8]  }
  0x52   : > { %522 = vmatpush3.xpose.msra.mxu0 %v270_v2  ;;  %v496_v23 = vld [vmem:[%s227_s21] ss:$0 sm:$0xff]  ;;  %s722_s30 = sshll.u32 %s811_s29, 4  ;;  %s723_s30 = int_to_ptr.vmem [resolvable:$false] %s722_s30 }
  0x53   : > { %523 = vmatprep.subr.mxu0 %v809_v0  ;;  %p720_p0 = pnand %p719_p9, %p1055_p13  ;;  %s724_s15 = scalar_lea.vmem %s723_s30, 256 }
  0x54   : > { %p725_p12 = scmp.lt.s32.totalorder %s373_s10, %s723_s30  ;;  %p726_p7 = scmp.lt.s32.totalorder %s724_s15, %s718_s22 }
  0x55   : > { %p721_p5 = pneg %p720_p0 }
  0x56   : > { %524 = vmatpush3.xpose.msra.mxu0 %v269_v4  ;;  %p727_p1 = por %p726_p7, %p725_p12 }
  0x57   : > { %525 = vmatprep.subr.mxu0 %v809_v0 }
  0x58   : > { %p728_p2 = pnand %p727_p1, %p721_p5 }
  0x5a   : > { %526 = vmatpush3.xpose.msra.mxu0 %v268_v6 }
  0x5b   : > { %527 = vmatprep.subr.mxu0 %v809_v0 }
  0x5e   : > { %528 = vmatpush3.xpose.msra.mxu0 %v267_v7 }
  0x5f   : > { %529 = vmatprep.subr.mxu0 %v809_v0 }
  0x62   : > { %530 = vmatpush3.xpose.msra.mxu0 %v266_v8 }
  0x63   : > { %531 = vmatprep.subr.mxu0 %v809_v0 }
  0x66   : > { %532 = vmatpush3.xpose.msra.mxu0 %v265_v9 }
  0x67   : > { %533 = vmatprep.subr.mxu0 %v809_v0 }
  0x6a   : > { %534 = vmatpush3.xpose.msra.mxu0 %v264_v10 }
  0x6b   : > { %535 = vmatprep.subr.mxu0 %v809_v0 }
  0x6e   : > { %536 = vmatpush3.xpose.msra.mxu0 %v263_v11 }
  0x6f   : > { %537 = vmatprep.subr.mxu0 %v809_v0 }
  0x72   : > { %538 = vmatpush3.xpose.msra.mxu0 %v262_v12 }
  0x73   : > { %539 = vmatprep.subr.mxu0 %v809_v0 }
  0x76   : > { %540 = vmatpush3.xpose.msra.mxu0 %v261_v13 }
  0x77   : > { %541 = vmatprep.subr.mxu0 %v809_v0 }
  0x7a   : > { %542 = vmatpush3.xpose.msra.mxu0 %v260_v14 }
  0x7b   : > { %543 = vmatprep.subr.mxu0 %v809_v0 }
  0x7e   : > { %544 = vmatpush3.xpose.msra.mxu0 %v259_v15 }
  0x7f   : > { %545 = vmatprep.subr.mxu0 %v809_v0 }
  0x82   : > { %546 = vmatpush3.xpose.msra.mxu0 %v258_v16 }
  0x83   : > { %547 = vmatprep.subr.mxu0 %v809_v0 }
  0x86   : > { %548 = vmatpush3.xpose.msra.mxu0 %v257_v17 }
  0x87   : > { %549 = vmatprep.subr.mxu0 %v809_v0 }
  0x8a   : > { %550 = vmatpush3.xpose.msra.mxu0 %v256_v18 }
  0x8d   : > { %552 = vmatmul.mubr.f32.vlgmr.msra.gmra.mxu0 %v255_v3 }
  0xd9   : > { %v344_v20 = vpop.xlane.xlu0 %343 }
 0x14d   : > { %v338_v19 = vpop.f32.mrf.mxu0 }
 0x14e   : > { %v345_v21 = vmul.f32 2.0, %v338_v19 }
 0x14f   : > { %v553_v22 = vpop.f32.mrf.mxu0 }
 0x150   : > { %v346_v24 = vsub.f32 %v344_v20, %v345_v21 }
 0x152   : > { %v354_v25 = vadd.f32 %v496_v23, %v346_v24 }
 0x154   : > { %355 = vst [vmem:[%s253_s28] sm:$0xff] %v354_v25 }
 0x155   : > { %731 = shalt.err (!%p728_p2)
}
 0x156   : > { %s732_s5 = scalar_lea.hbm %s370_s27, 128  ;;  %s736_s8 = scalar_lea.hbm %s1042_s3, 640 }
 0x157   : > { %p733_p4 = scmp.ne.s32.totalorder %s370_s27, %s732_s5  ;;  %p737_p6 = scmp.lt.s32.totalorder %s370_s27, %s1042_s3 }
 0x158   : > { %p738_p10 = scmp.lt.s32.totalorder %s736_s8, %s732_s5 }
 0x159   : > { %p734_p8 = pnand %p733_p4, %p1055_p13 }
 0x15a   : > { %p739_p3 = por %p738_p10, %p737_p6 }
 0x15b   : > { %p735_p11 = pneg %p734_p8 }
 0x15d   : > { %p740_p9 = pnand %p739_p3, %p735_p11 }
 0x15f   : > { %743 = shalt.err (!%p740_p9)
}
 0x160   : > { %562 = dma.vmem_to_hbm [thread:$0]  (%p1055_p13), %s373_s10, 128, %s370_s27, %s357_s4  }
 0x161 PF: > { %p582_p0 = scmp.ge.s32.totalorder %s802_s17, 2  ;;  %s384_s21 = sand.u32 1, %s782_s12  }
 0x162   : > { %p1056_p5 = scmp.ne.s32.totalorder %s1049_s25, 0  ;;  %s385_s26 = scalar_lea.sflag [#allocation4], %s384_s21 }
 0x164   : > { %p576_p12 = pnand %p582_p0, %p1056_p5 }
 0x166   : > { %p577_p7 = pneg %p576_p12 }
 0x168   : > { %777 = dma.done.wait (%p577_p7), %s385_s26, 128  }
 0x169   : > { %779 = vsyncadd (%p577_p7), %s385_s26, 4294967168  ;;  %s20_s17 = sadd.s32 1, %s802_s17   ;;  %s1057_s12 = smov %s786_s13 }
 0x16a   : > { %p17_p1 = scmp.ge.s32.totalorder %s20_s17, 7   ;;  %s1058_s13 = smov %s790_s14 }
 0x16b   : > { %s1059_s14 = smov %s879_s24  ;;  %s1060_s15 = smov %s798_s16 }
 0x16c   : > { %s1061_s16 = smov %s1063_s18  ;;  %19 = sbr.rel (!%p17_p1) target bundleno = 7 (0x7), region = 94 }
 0x171   :  { %390 = vsyncpa [#allocation3], 1 }
 0x172   :  { %392 = vsyncpa [#allocation3 + $0x1], 1 }
 0x173   :  { %393 = vsyncpa [#allocation6], 1 }
 0x174   :  { %395 = vsyncpa [#allocation6 + $0x1], 1 }
 0x175   :  { %396 = vsyncpa [#allocation4], 1 }
 0x176   :  { %398 = vsyncpa [#allocation4 + $0x1], 1 }

</bundles_post_ra>
